<compile_context>
chip_gen: v5e
topology: v5e:2x2
jax: 0.10.0
libtpu: 0.0.40
codegen_flags: <defaults>
</compile_context>

<pallas_src>
import functools

import jax
import jax.numpy as jnp
from jax.experimental import pallas as pl
from jax.experimental.pallas import tpu as pltpu


_MAX_TILE_ELEMS = 1 << 20          # 1M f32 per input tile (4 MiB); x2 inputs x2 buffers = 16 MiB
_VMEM_LIMIT_BYTES = 32 * 1024 * 1024


def _pick_tile(dim, unit, max_size):
    """Largest tile <= max_size that divides `dim` and is a multiple of `unit`.
    A tile equal to the full dim is always legal (bypasses the (8,128) rule)."""
    if dim <= max_size:
        return dim
    t = (max_size // unit) * unit
    while t >= unit:
        if dim % t == 0:
            return t
        t -= unit
    return dim


# ----------------------------------------------------------------------------
# Stage 1: per-(batch, channel) spatial statistics, single pass over HBM.
#   inputs  : fm_s, fm_t viewed as [B*C, H*W]
#   outputs : sum(t), sum(s*s), sum(t*t), sum(s*t), each [B*C, 1] f32
# ----------------------------------------------------------------------------
def _afd_stats_kernel(s_ref, t_ref,
                      tsum_ref, ss_ref, tt_ref, st_ref,
                      acc_t, acc_ss, acc_tt, acc_st):
    j = pl.program_id(1)                    # spatial reduction axis (inner, "arbitrary")

    @pl.when(j == 0)
    def _():
        acc_t[...] = jnp.zeros_like(acc_t)
        acc_ss[...] = jnp.zeros_like(acc_ss)
        acc_tt[...] = jnp.zeros_like(acc_tt)
        acc_st[...] = jnp.zeros_like(acc_st)

    s = s_ref[...].astype(jnp.float32)
    t = t_ref[...].astype(jnp.float32)

    # Per-row partial sums into VMEM vector accumulators (no SMEM scalars).
    acc_t[...] += jnp.sum(t, axis=-1, keepdims=True)
    acc_ss[...] += jnp.sum(s * s, axis=-1, keepdims=True)
    acc_tt[...] += jnp.sum(t * t, axis=-1, keepdims=True)
    acc_st[...] += jnp.sum(s * t, axis=-1, keepdims=True)

    @pl.when(j == pl.num_programs(1) - 1)
    def _():
        tsum_ref[...] = acc_t[...]
        ss_ref[...] = acc_ss[...]
        tt_ref[...] = acc_tt[...]
        st_ref[...] = acc_st[...]


# ----------------------------------------------------------------------------
# Stage 2: attention MLP + rho-weighted normalized MSE (tiny, single block).
# ----------------------------------------------------------------------------
def _afd_finalize_kernel(tsum_ref, ss_ref, tt_ref, st_ref,
                         w1_ref, b1_ref, w2_ref, b2_ref,
                         o_ref, *, inv_hw, inv_b, eps):
    pooled = tsum_ref[...] * inv_hw                                   # adaptive_avg_pool2d -> [B, C]

    # 1x1 convs on [B, C, 1, 1] == dense layers over the channel dim.
    h = jax.lax.dot_general(pooled, w1_ref[...],
                            (((1,), (1,)), ((), ())),
                            preferred_element_type=jnp.float32) + b1_ref[...]   # [B, mid]
    h = jnp.maximum(h, 0.0)                                           # ReLU
    att = jax.lax.dot_general(h, w2_ref[...],
                              (((1,), (1,)), ((), ())),
                              preferred_element_type=jnp.float32) + b2_ref[...]  # [B, C]

    rho = 1.0 / (1.0 + jnp.exp(-att))                                 # sigmoid
    rho = rho / jnp.sum(rho, axis=-1, keepdims=True)                  # normalize over channels

    ss = ss_ref[...]
    tt = tt_ref[...]
    st = st_ref[...]
    inv_s = 1.0 / (jnp.sqrt(ss) + eps)                                # 1/(||fm_s|| + eps)
    inv_t = 1.0 / (jnp.sqrt(tt) + eps)
    # mean_{HW}((s/(|s|+eps) - t/(|t|+eps))^2), expanded via per-channel sums.
    mse = (ss * inv_s * inv_s
           - 2.0 * st * (inv_s * inv_t)
           + tt * inv_t * inv_t) * inv_hw                             # [B, C]

    o_ref[0, 0] = jnp.sum(rho * mse) * inv_b                          # sum over C, mean over B


# ----------------------------------------------------------------------------
# Wrapper
# ----------------------------------------------------------------------------
def afd_loss(fm_s, fm_t, w1, b1, w2, b2, eps=1e-6):
    """AFD distillation loss (Pallas TPU kernels).

    fm_s, fm_t : [B, C, H, W] student / teacher feature maps
    w1 : [mid, C], b1 : [mid]   (first 1x1 conv)
    w2 : [C, mid], b2 : [C]     (second 1x1 conv)
    """
    assert fm_s.shape == fm_t.shape and fm_s.ndim == 4
    B, C, H, W = fm_s.shape
    mid = w1.shape[0]
    assert w1.shape == (mid, C) and w2.shape == (C, mid)
    assert b1.shape == (mid,) and b2.shape == (C,)

    BC, HW = B * C, H * W
    s2 = fm_s.reshape(BC, HW)
    t2 = fm_t.reshape(BC, HW)

    # ---- tile selection: biggest lane-dense tiles under the VMEM budget ----
    itemsize = jnp.dtype(fm_s.dtype).itemsize
    row_unit = {4: 8, 2: 16, 1: 32}.get(itemsize, 8)   # packed-sublane tiling for narrow dtypes
    tile_cols = _pick_tile(HW, 128, min(HW, _MAX_TILE_ELEMS))
    tile_rows = _pick_tile(BC, row_unit,
                           min(BC, max(row_unit, _MAX_TILE_ELEMS // tile_cols)))
    grid = (BC // tile_rows, HW // tile_cols)

    cost = pl.CostEstimate(
        flops=8 * BC * HW,
        transcendentals=0,
        bytes_accessed=2 * BC * HW * itemsize + 4 * BC * 4,
    )

    stat_shape = jax.ShapeDtypeStruct((BC, 1), jnp.float32)
    stat_spec = pl.BlockSpec((tile_rows, 1), lambda i, j: (i, 0))
    in_spec = pl.BlockSpec((tile_rows, tile_cols), lambda i, j: (i, j))

    tsum, ss, tt, st = pl.pallas_call(
        _afd_stats_kernel,
        out_shape=(stat_shape, stat_shape, stat_shape, stat_shape),
        grid_spec=pltpu.PrefetchScalarGridSpec(
            num_scalar_prefetch=0,
            grid=grid,
            in_specs=[in_spec, in_spec],
            out_specs=[stat_spec for _ in range(4)],
            scratch_shapes=[pltpu.VMEM((tile_rows, 1), jnp.float32) for _ in range(4)],
        ),
        compiler_params=pltpu.CompilerParams(
            dimension_semantics=("parallel", "arbitrary"),
            vmem_limit_bytes=_VMEM_LIMIT_BYTES,
        ),
        cost_estimate=cost,
    )(s2, t2)

    # Tiny [B*C, 1] stats -> [B, C] for the finalize kernel (cheap XLA reshapes).
    tsum = tsum.reshape(B, C)
    ss = ss.reshape(B, C)
    tt = tt.reshape(B, C)
    st = st.reshape(B, C)
    w1f = w1.astype(jnp.float32)
    w2f = w2.astype(jnp.float32)
    b1_2d = b1.reshape(1, mid).astype(jnp.float32)
    b2_2d = b2.reshape(1, C).astype(jnp.float32)

    fin_kernel = functools.partial(
        _afd_finalize_kernel,
        inv_hw=1.0 / float(HW),
        inv_b=1.0 / float(B),
        eps=float(eps),
    )

    def full(shape):
        return pl.BlockSpec(shape, lambda i: (0,) * len(shape))

    out = pl.pallas_call(
        fin_kernel,
        out_shape=jax.ShapeDtypeStruct((1, 1), jnp.float32),
        grid_spec=pltpu.PrefetchScalarGridSpec(
            num_scalar_prefetch=0,
            grid=(1,),
            in_specs=[
                full((B, C)), full((B, C)), full((B, C)), full((B, C)),
                full((mid, C)), full((1, mid)), full((C, mid)), full((1, C)),
            ],
            out_specs=full((1, 1)),
        ),
        compiler_params=pltpu.CompilerParams(
            dimension_semantics=("arbitrary",),
        ),
    )(tsum, ss, tt, st, w1f, b1_2d, w2f, b2_2d)

    return out[0, 0]


# ----------------------------------------------------------------------------
# Pure-JAX reference (mirrors the PyTorch forward) for the correctness check.
# ----------------------------------------------------------------------------
def _afd_reference(fm_s, fm_t, w1, b1, w2, b2, eps=1e-6):
    pooled = jnp.mean(fm_t, axis=(2, 3))                              # [B, C]
    h = jnp.maximum(pooled @ w1.T + b1, 0.0)                          # [B, mid]
    att = h @ w2.T + b2                                               # [B, C]
    rho = jax.nn.sigmoid(att)
    rho = rho / jnp.sum(rho, axis=1, keepdims=True)
    s_norm = jnp.sqrt(jnp.sum(fm_s ** 2, axis=(2, 3), keepdims=True))
    t_norm = jnp.sqrt(jnp.sum(fm_t ** 2, axis=(2, 3), keepdims=True))
    fs = fm_s / (s_norm + eps)
    ft = fm_t / (t_norm + eps)
    mse = jnp.mean((fs - ft) ** 2, axis=(2, 3))                       # [B, C]
    return jnp.mean(jnp.sum(rho * mse, axis=1))


if __name__ == "__main__":
    key = jax.random.PRNGKey(0)
    k_s, k_t, k_w1, k_w2 = jax.random.split(key, 4)

    # Student / teacher feature maps: [batch=2, channels=32, H=16, W=16]
    B, C, H, W = 2, 32, 16, 16
    att_f = 0.5
    mid = int(C * att_f)

    fm_s = jax.random.normal(k_s, (B, C, H, W), dtype=jnp.float32)
    fm_t = jax.random.normal(k_t, (B, C, H, W), dtype=jnp.float32)

    # 1x1-conv attention weights (kaiming fan_out scale), zero biases (as in the module init).
    w1 = jax.random.normal(k_w1, (mid, C), dtype=jnp.float32) * jnp.sqrt(2.0 / mid)
    b1 = jnp.zeros((mid,), dtype=jnp.float32)
    w2 = jax.random.normal(k_w2, (C, mid), dtype=jnp.float32) * jnp.sqrt(2.0 / C)
    b2 = jnp.zeros((C,), dtype=jnp.float32)

    loss = afd_loss(fm_s, fm_t, w1, b1, w2, b2)
    loss = jax.block_until_ready(loss)

    ref = _afd_reference(fm_s, fm_t, w1, b1, w2, b2)
    assert jnp.allclose(loss, ref, rtol=1e-3, atol=1e-6), (loss, ref)

    print("KERNEL_OK")
</pallas_src>

<mosaic_0001>
module attributes {stable_mosaic.version = 11 : i64} {
  func.func @_afd_stats_kernel(%arg0: i32, %arg1: i32, %arg2: memref<64x256xf32, #tpu.memory_space<vmem>>, %arg3: memref<64x256xf32, #tpu.memory_space<vmem>>, %arg4: memref<64x1xf32, #tpu.memory_space<vmem>>, %arg5: memref<64x1xf32, #tpu.memory_space<vmem>>, %arg6: memref<64x1xf32, #tpu.memory_space<vmem>>, %arg7: memref<64x1xf32, #tpu.memory_space<vmem>>, %arg8: memref<64x1xf32, #tpu.memory_space<vmem>>, %arg9: memref<64x1xf32, #tpu.memory_space<vmem>>, %arg10: memref<64x1xf32, #tpu.memory_space<vmem>>, %arg11: memref<64x1xf32, #tpu.memory_space<vmem>>) attributes {dimension_semantics = [#tpu.dimension_semantics<parallel>, #tpu.dimension_semantics<arbitrary>], iteration_bounds = array<i64: 1, 1>, scalar_prefetch = 0 : i64, scratch_operands = 4 : i64, tpu.core_type = #tpu.core_type<tc>, window_params = [{transform_indices = @transform_0, window_bounds = array<i64: 64, 256>}, {transform_indices = @transform_1, window_bounds = array<i64: 64, 256>}, {transform_indices = @transform_2, window_bounds = array<i64: 64, 1>}, {transform_indices = @transform_3, window_bounds = array<i64: 64, 1>}, {transform_indices = @transform_4, window_bounds = array<i64: 64, 1>}, {transform_indices = @transform_5, window_bounds = array<i64: 64, 1>}]} {
    %c0_i32 = arith.constant 0 : i32
    %0 = arith.cmpi eq, %arg1, %c0_i32 : i32
    %1 = arith.extui %0 : i1 to i32
    %c0_i32_0 = arith.constant 0 : i32
    %2 = arith.cmpi ne, %1, %c0_i32_0 : i32
    scf.if %2 {
      %cst_25 = arith.constant 0.000000e+00 : f32
      %31 = vector.broadcast %cst_25 : f32 to vector<64x1xf32>
      %c0_26 = arith.constant 0 : index
      %c0_27 = arith.constant 0 : index
      %32 = vector.load %arg8[%c0_26, %c0_27] : memref<64x1xf32, #tpu.memory_space<vmem>>, vector<64x1xf32>
      tpu.vector_store %arg8[%c0_26, %c0_27], %31 {strides = array<i32>} : memref<64x1xf32, #tpu.memory_space<vmem>>, vector<64x1xf32>,
      %cst_28 = arith.constant 0.000000e+00 : f32
      %33 = vector.broadcast %cst_28 : f32 to vector<64x1xf32>
      %c0_29 = arith.constant 0 : index
      %c0_30 = arith.constant 0 : index
      %34 = vector.load %arg9[%c0_29, %c0_30] : memref<64x1xf32, #tpu.memory_space<vmem>>, vector<64x1xf32>
      tpu.vector_store %arg9[%c0_29, %c0_30], %33 {strides = array<i32>} : memref<64x1xf32, #tpu.memory_space<vmem>>, vector<64x1xf32>,
      %cst_31 = arith.constant 0.000000e+00 : f32
      %35 = vector.broadcast %cst_31 : f32 to vector<64x1xf32>
      %c0_32 = arith.constant 0 : index
      %c0_33 = arith.constant 0 : index
      %36 = vector.load %arg10[%c0_32, %c0_33] : memref<64x1xf32, #tpu.memory_space<vmem>>, vector<64x1xf32>
      tpu.vector_store %arg10[%c0_32, %c0_33], %35 {strides = array<i32>} : memref<64x1xf32, #tpu.memory_space<vmem>>, vector<64x1xf32>,
      %cst_34 = arith.constant 0.000000e+00 : f32
      %37 = vector.broadcast %cst_34 : f32 to vector<64x1xf32>
      %c0_35 = arith.constant 0 : index
      %c0_36 = arith.constant 0 : index
      %38 = vector.load %arg11[%c0_35, %c0_36] : memref<64x1xf32, #tpu.memory_space<vmem>>, vector<64x1xf32>
      tpu.vector_store %arg11[%c0_35, %c0_36], %37 {strides = array<i32>} : memref<64x1xf32, #tpu.memory_space<vmem>>, vector<64x1xf32>,
    } else {
    }
    %c0 = arith.constant 0 : index
    %c0_1 = arith.constant 0 : index
    %3 = vector.load %arg2[%c0, %c0_1] : memref<64x256xf32, #tpu.memory_space<vmem>>, vector<64x256xf32>
    %c0_2 = arith.constant 0 : index
    %c0_3 = arith.constant 0 : index
    %4 = vector.load %arg3[%c0_2, %c0_3] : memref<64x256xf32, #tpu.memory_space<vmem>>, vector<64x256xf32>
    %c0_4 = arith.constant 0 : index
    %c0_5 = arith.constant 0 : index
    %5 = vector.load %arg8[%c0_4, %c0_5] : memref<64x1xf32, #tpu.memory_space<vmem>>, vector<64x1xf32>
    %cst = arith.constant dense<0.000000e+00> : vector<64xf32>
    %6 = vector.multi_reduction <add>, %4, %cst [1] : vector<64x256xf32> to vector<64xf32>
    %7 = vector.shape_cast %6 : vector<64xf32> to vector<64x1xf32>
    %8 = arith.addf %5, %7 : vector<64x1xf32>
    %c0_6 = arith.constant 0 : index
    %c0_7 = arith.constant 0 : index
    %9 = vector.load %arg8[%c0_6, %c0_7] : memref<64x1xf32, #tpu.memory_space<vmem>>, vector<64x1xf32>
    tpu.vector_store %arg8[%c0_6, %c0_7], %8 {strides = array<i32>} : memref<64x1xf32, #tpu.memory_space<vmem>>, vector<64x1xf32>,
    %c0_8 = arith.constant 0 : index
    %c0_9 = arith.constant 0 : index
    %10 = vector.load %arg9[%c0_8, %c0_9] : memref<64x1xf32, #tpu.memory_space<vmem>>, vector<64x1xf32>
    %11 = arith.mulf %3, %3 : vector<64x256xf32>
    %cst_10 = arith.constant dense<0.000000e+00> : vector<64xf32>
    %12 = vector.multi_reduction <add>, %11, %cst_10 [1] : vector<64x256xf32> to vector<64xf32>
    %13 = vector.shape_cast %12 : vector<64xf32> to vector<64x1xf32>
    %14 = arith.addf %10, %13 : vector<64x1xf32>
    %c0_11 = arith.constant 0 : index
    %c0_12 = arith.constant 0 : index
    %15 = vector.load %arg9[%c0_11, %c0_12] : memref<64x1xf32, #tpu.memory_space<vmem>>, vector<64x1xf32>
    tpu.vector_store %arg9[%c0_11, %c0_12], %14 {strides = array<i32>} : memref<64x1xf32, #tpu.memory_space<vmem>>, vector<64x1xf32>,
    %c0_13 = arith.constant 0 : index
    %c0_14 = arith.constant 0 : index
    %16 = vector.load %arg10[%c0_13, %c0_14] : memref<64x1xf32, #tpu.memory_space<vmem>>, vector<64x1xf32>
    %17 = arith.mulf %4, %4 : vector<64x256xf32>
    %cst_15 = arith.constant dense<0.000000e+00> : vector<64xf32>
    %18 = vector.multi_reduction <add>, %17, %cst_15 [1] : vector<64x256xf32> to vector<64xf32>
    %19 = vector.shape_cast %18 : vector<64xf32> to vector<64x1xf32>
    %20 = arith.addf %16, %19 : vector<64x1xf32>
    %c0_16 = arith.constant 0 : index
    %c0_17 = arith.constant 0 : index
    %21 = vector.load %arg10[%c0_16, %c0_17] : memref<64x1xf32, #tpu.memory_space<vmem>>, vector<64x1xf32>
    tpu.vector_store %arg10[%c0_16, %c0_17], %20 {strides = array<i32>} : memref<64x1xf32, #tpu.memory_space<vmem>>, vector<64x1xf32>,
    %c0_18 = arith.constant 0 : index
    %c0_19 = arith.constant 0 : index
    %22 = vector.load %arg11[%c0_18, %c0_19] : memref<64x1xf32, #tpu.memory_space<vmem>>, vector<64x1xf32>
    %23 = arith.mulf %3, %4 : vector<64x256xf32>
    %cst_20 = arith.constant dense<0.000000e+00> : vector<64xf32>
    %24 = vector.multi_reduction <add>, %23, %cst_20 [1] : vector<64x256xf32> to vector<64xf32>
    %25 = vector.shape_cast %24 : vector<64xf32> to vector<64x1xf32>
    %26 = arith.addf %22, %25 : vector<64x1xf32>
    %c0_21 = arith.constant 0 : index
    %c0_22 = arith.constant 0 : index
    %27 = vector.load %arg11[%c0_21, %c0_22] : memref<64x1xf32, #tpu.memory_space<vmem>>, vector<64x1xf32>
    tpu.vector_store %arg11[%c0_21, %c0_22], %26 {strides = array<i32>} : memref<64x1xf32, #tpu.memory_space<vmem>>, vector<64x1xf32>,
    %c0_i32_23 = arith.constant 0 : i32
    %28 = arith.cmpi eq, %arg1, %c0_i32_23 : i32
    %29 = arith.extui %28 : i1 to i32
    %c0_i32_24 = arith.constant 0 : i32
    %30 = arith.cmpi ne, %29, %c0_i32_24 : i32
    scf.if %30 {
      %c0_25 = arith.constant 0 : index
      %c0_26 = arith.constant 0 : index
      %31 = vector.load %arg8[%c0_25, %c0_26] : memref<64x1xf32, #tpu.memory_space<vmem>>, vector<64x1xf32>
      %c0_27 = arith.constant 0 : index
      %c0_28 = arith.constant 0 : index
      %32 = vector.load %arg4[%c0_27, %c0_28] : memref<64x1xf32, #tpu.memory_space<vmem>>, vector<64x1xf32>
      tpu.vector_store %arg4[%c0_27, %c0_28], %31 {strides = array<i32>} : memref<64x1xf32, #tpu.memory_space<vmem>>, vector<64x1xf32>,
      %c0_29 = arith.constant 0 : index
      %c0_30 = arith.constant 0 : index
      %33 = vector.load %arg9[%c0_29, %c0_30] : memref<64x1xf32, #tpu.memory_space<vmem>>, vector<64x1xf32>
      %c0_31 = arith.constant 0 : index
      %c0_32 = arith.constant 0 : index
      %34 = vector.load %arg5[%c0_31, %c0_32] : memref<64x1xf32, #tpu.memory_space<vmem>>, vector<64x1xf32>
      tpu.vector_store %arg5[%c0_31, %c0_32], %33 {strides = array<i32>} : memref<64x1xf32, #tpu.memory_space<vmem>>, vector<64x1xf32>,
      %c0_33 = arith.constant 0 : index
      %c0_34 = arith.constant 0 : index
      %35 = vector.load %arg10[%c0_33, %c0_34] : memref<64x1xf32, #tpu.memory_space<vmem>>, vector<64x1xf32>
      %c0_35 = arith.constant 0 : index
      %c0_36 = arith.constant 0 : index
      %36 = vector.load %arg6[%c0_35, %c0_36] : memref<64x1xf32, #tpu.memory_space<vmem>>, vector<64x1xf32>
      tpu.vector_store %arg6[%c0_35, %c0_36], %35 {strides = array<i32>} : memref<64x1xf32, #tpu.memory_space<vmem>>, vector<64x1xf32>,
      %c0_37 = arith.constant 0 : index
      %c0_38 = arith.constant 0 : index
      %37 = vector.load %arg11[%c0_37, %c0_38] : memref<64x1xf32, #tpu.memory_space<vmem>>, vector<64x1xf32>
      %c0_39 = arith.constant 0 : index
      %c0_40 = arith.constant 0 : index
      %38 = vector.load %arg7[%c0_39, %c0_40] : memref<64x1xf32, #tpu.memory_space<vmem>>, vector<64x1xf32>
      tpu.vector_store %arg7[%c0_39, %c0_40], %37 {strides = array<i32>} : memref<64x1xf32, #tpu.memory_space<vmem>>, vector<64x1xf32>,
    } else {
    }
    return
  }
  func.func @transform_0(%arg0: i32, %arg1: i32) -> (i32, i32) {
    %c0_i32 = arith.constant 0 : i32
    return %arg0, %arg1 : i32, i32
  }
  func.func @transform_1(%arg0: i32, %arg1: i32) -> (i32, i32) {
    %c0_i32 = arith.constant 0 : i32
    return %arg0, %arg1 : i32, i32
  }
  func.func @transform_2(%arg0: i32, %arg1: i32) -> (i32, i32) {
    %c0_i32 = arith.constant 0 : i32
    %c0_i32_0 = arith.constant 0 : i32
    return %arg0, %c0_i32 : i32, i32
  }
  func.func @transform_3(%arg0: i32, %arg1: i32) -> (i32, i32) {
    %c0_i32 = arith.constant 0 : i32
    %c0_i32_0 = arith.constant 0 : i32
    return %arg0, %c0_i32 : i32, i32
  }
  func.func @transform_4(%arg0: i32, %arg1: i32) -> (i32, i32) {
    %c0_i32 = arith.constant 0 : i32
    %c0_i32_0 = arith.constant 0 : i32
    return %arg0, %c0_i32 : i32, i32
  }
  func.func @transform_5(%arg0: i32, %arg1: i32) -> (i32, i32) {
    %c0_i32 = arith.constant 0 : i32
    %c0_i32_0 = arith.constant 0 : i32
    return %arg0, %c0_i32 : i32, i32
  }
}

</mosaic_0001>

<bundles_post_ra>
// kernel: tpu_custom_call.1
= control target key start
LH: loop header
LB: loop body
LE: loop exit
PB: predicated region body
PF: predicated region fallthrough
CT: control target
= control target key end

     0   :  { %11 = vsyncpa [#allocation7], 0  ;;  %s933_s0 = inlined_call_operand.hbm [shape: f32[64,256], index: 0, kind: input, shape index: {}]   ;;  %s934_s1 = inlined_call_operand.hbm [shape: f32[64,256], index: 1, kind: input, shape index: {}]   ;;  %s935_s2 = inlined_call_operand.vmem [shape: f32[64,1], index: 2, kind: output, shape index: {0}]   ;;  %s936_s3 = inlined_call_operand.vmem [shape: f32[64,1], index: 3, kind: output, shape index: {1}]   ;;  %s937_s4 = inlined_call_operand.vmem [shape: f32[64,1], index: 4, kind: output, shape index: {2}]   ;;  %s938_s5 = inlined_call_operand.vmem [shape: f32[64,1], index: 5, kind: output, shape index: {3}]  }
   0x1   :  { %s17_s20 = sshll.u32 %s933_s0, 4  ;;  %s18_s20 = int_to_ptr.hbm [resolvable:$true] %s17_s20 }
   0x2   :  { %12 = vsyncpa [#allocation9], 0  ;;  %s499_s21 = smov [#allocation6]   ;;  %s30_s25 = sshll.u32 %s934_s1, 4  ;;  %s31_s25 = int_to_ptr.hbm [resolvable:$true] %s30_s25 }
   0x3   :  { %s19_s22 = sshll.u32 %s499_s21, 4  ;;  %s500_s26 = smov 256   ;;  %s20_s22 = int_to_ptr.vmem [resolvable:$true] %s19_s22 }
   0x4   :  { %s501_s27 = smov 16   ;;  %s502_s28 = smov [#allocation8]  }
   0x5   :  { %25 = dma.hbm_to_vmem [thread:$0]  %s18_s20, 2048, %s20_s22, [#allocation7], %s500_s26, %s500_s26, %s501_s27  }
   0x6   :  { %s32_s29 = sshll.u32 %s502_s28, 4  ;;  %s33_s29 = int_to_ptr.vmem [resolvable:$true] %s32_s29 }
   0x7   :  { %38 = dma.hbm_to_vmem [thread:$0]  %s31_s25, 2048, %s33_s29, [#allocation9], %s500_s26, %s500_s26, %s501_s27  }
   0x8   :  { %495 = dma.done.wait [#allocation7], 2048  }
   0x9   :  { %496 = vsyncadd [#allocation7], 4294965248 }
   0xa   :  { %497 = dma.done.wait [#allocation9], 2048  }
   0xb   :  { %498 = vsyncadd [#allocation9], 4294965248  ;;  %v540_v0 = vld [vmem:[#allocation8 + $0x20] sm:$0xff]  ;;  %v542_v1 = vld [vmem:[#allocation8 + $0x28] sm:$0xff]  ;;  %vm51_vm0 = vcmask 7168  }
   0xc   :  { %v544_v2 = vld [vmem:[#allocation8] sm:$0xff]  ;;  %v130_v3 = vadd.f32 %v542_v1, %v540_v0  ;;  %v548_v4 = vld [vmem:[#allocation8 + $0x8] sm:$0xff]  ;;  %v558_v9 = vld [vmem:[#allocation8 + $0x30] sm:$0xff] }
   0xd   :  { %v550_v5 = vld [vmem:[#allocation8 + $0x40] sm:$0xff]  ;;  %v552_v6 = vld [vmem:[#allocation8 + $0x48] sm:$0xff]  ;;  %v124_v7 = vadd.f32 %v548_v4, %v544_v2  ;;  %v560_v10 = vld [vmem:[#allocation8 + $0x38] sm:$0xff]  ;;  %v237_v61 = vmul.f32 %v544_v2, %v544_v2  ;;  %v238_v62 = vmul.f32 %v548_v4, %v548_v4 }
   0xe   :  { %v136_v8 = vadd.f32 %v552_v6, %v550_v5  ;;  %131 = vadd.xlane.f32.xlu1 %v130_v3  ;;  %v562_v11 = vld [vmem:[#allocation8 + $0x10] sm:$0xff]  ;;  %v564_v12 = vld [vmem:[#allocation8 + $0x18] sm:$0xff]  ;;  %v133_v15 = vadd.f32 %v560_v10, %v558_v9  ;;  %v576_v18 = vld [vmem:[#allocation6] sm:$0xff] }
   0xf   :  { %125 = vadd.xlane.f32.xlu0 %v124_v7  ;;  %v566_v13 = vld [vmem:[#allocation8 + $0x50] sm:$0xff]  ;;  %v568_v14 = vld [vmem:[#allocation8 + $0x58] sm:$0xff]  ;;  %v127_v16 = vadd.f32 %v564_v12, %v562_v11  ;;  %v578_v19 = vld [vmem:[#allocation6 + $0x8] sm:$0xff]  ;;  %v173_v22 = vmul.f32 %v576_v18, %v576_v18  ;;  %v239_v7 = vmul.f32 %v562_v11, %v562_v11 }
  0x10   :  { %137 = vadd.xlane.f32.xlu2 %v136_v8  ;;  %v139_v17 = vadd.f32 %v568_v14, %v566_v13  ;;  %v580_v20 = vld [vmem:[#allocation8 + $0x70] sm:$0xff]  ;;  %v582_v21 = vld [vmem:[#allocation8 + $0x78] sm:$0xff]  ;;  %v174_v23 = vmul.f32 %v578_v19, %v578_v19  ;;  %v588_v24 = vld [vmem:[#allocation8 + $0x60] sm:$0xff]  ;;  %v240_v8 = vmul.f32 %v564_v12, %v564_v12 }
  0x11   :  { %v590_v25 = vld [vmem:[#allocation8 + $0x68] sm:$0xff]  ;;  %v145_v26 = vadd.f32 %v582_v21, %v580_v20  ;;  %v596_v28 = vld [vmem:[#allocation6 + $0x20] sm:$0xff]  ;;  %v600_v30 = vld [vmem:[#allocation6 + $0x10] sm:$0xff] }
  0x12   :  { %v142_v27 = vadd.f32 %v590_v25, %v588_v24  ;;  %v598_v29 = vld [vmem:[#allocation6 + $0x28] sm:$0xff]  ;;  %v189_v31 = vadd.f32 %v174_v23, %v173_v22  ;;  %v602_v32 = vld [vmem:[#allocation6 + $0x18] sm:$0xff]  ;;  %v604_v33 = vld [vmem:[#allocation6 + $0x30] sm:$0xff]  ;;  %v177_v35 = vmul.f32 %v596_v28, %v596_v28  ;;  %v175_v37 = vmul.f32 %v600_v30, %v600_v30 }
  0x13   :  { %v606_v34 = vld [vmem:[#allocation6 + $0x38] sm:$0xff]  ;;  %v178_v36 = vmul.f32 %v598_v29, %v598_v29  ;;  %v176_v38 = vmul.f32 %v602_v32, %v602_v32  ;;  %v179_v39 = vmul.f32 %v604_v33, %v604_v33  ;;  %v620_v43 = vld [vmem:[#allocation6 + $0x50] sm:$0xff]  ;;  %v92_v45 = vld [vmem:[#allocation6 + $0x40] sm:$0xff]  ;;  %v253_v22 = vadd.f32 %v238_v62, %v237_v61 }
  0x14   :  { %v180_v40 = vmul.f32 %v606_v34, %v606_v34  ;;  %v622_v44 = vld [vmem:[#allocation6 + $0x58] sm:$0xff]  ;;  %v93_v47 = vld [vmem:[#allocation6 + $0x48] sm:$0xff]  ;;  %v624_v48 = vld [vmem:[#allocation6 + $0x60] sm:$0xff]  ;;  %v183_v50 = vmul.f32 %v620_v43, %v620_v43  ;;  %v181_v52 = vmul.f32 %v92_v45, %v92_v45 }
  0x15   :  { %v195_v41 = vadd.f32 %v178_v36, %v177_v35  ;;  %v192_v42 = vadd.f32 %v176_v38, %v175_v37  ;;  %v626_v49 = vld [vmem:[#allocation6 + $0x68] sm:$0xff]  ;;  %v184_v51 = vmul.f32 %v622_v44, %v622_v44  ;;  %v182_v53 = vmul.f32 %v93_v47, %v93_v47  ;;  %v636_v58 = vld [vmem:[#allocation6 + $0x70] sm:$0xff]  ;;  %v638_v59 = vld [vmem:[#allocation6 + $0x78] sm:$0xff] }
  0x16   :  { %134 = vadd.xlane.f32.xlu1 %v133_v15  ;;  %v198_v46 = vadd.f32 %v180_v40, %v179_v39  ;;  %v185_v54 = vmul.f32 %v624_v48, %v624_v48  ;;  %v186_v55 = vmul.f32 %v626_v49, %v626_v49  ;;  %v187_v63 = vmul.f32 %v636_v58, %v636_v58 }
  0x17   :  { %128 = vadd.xlane.f32.xlu0 %v127_v16  ;;  %v204_v56 = vadd.f32 %v184_v51, %v183_v50  ;;  %v201_v57 = vadd.f32 %v182_v53, %v181_v52  ;;  %v188_v3 = vmul.f32 %v638_v59, %v638_v59  ;;  %v309_v15 = vmul.f32 %v550_v5, %v92_v45 }
  0x18   :  { %140 = vadd.xlane.f32.xlu2 %v139_v17  ;;  %v207_v60 = vadd.f32 %v186_v55, %v185_v54  ;;  %v310_v16 = vmul.f32 %v552_v6, %v93_v47  ;;  %v241_v35 = vmul.f32 %v540_v0, %v540_v0  ;;  %v242_v36 = vmul.f32 %v542_v1, %v542_v1 }
  0x19   :  { %v210_v23 = vadd.f32 %v188_v3, %v187_v63  ;;  %v245_v37 = vmul.f32 %v550_v5, %v550_v5  ;;  %v246_v38 = vmul.f32 %v552_v6, %v552_v6  ;;  %v250_v45 = vmul.f32 %v590_v25, %v590_v25 }
  0x1a   :  { %v654_v17 = vadd.f32 %v310_v16, %v309_v15  ;;  %v259_v40 = vadd.f32 %v242_v36, %v241_v35  ;;  %v248_v47 = vmul.f32 %v568_v14, %v568_v14  ;;  %v251_v5 = vmul.f32 %v580_v20, %v580_v20 }
  0x1b   :  { %v252_v6 = vmul.f32 %v582_v21, %v582_v21  ;;  %v503_v50 = vmov 0.0   ;;  %v303_v54 = vmul.f32 %v562_v11, %v600_v30  ;;  %v304_v55 = vmul.f32 %v564_v12, %v602_v32 }
  0x1c   :  { %54 = vst.msk [vmem:[#allocation2 + $0x10] sm:$0xff] %vm51_vm0, %v503_v50  ;;  %v306_v11 = vmul.f32 %v542_v1, %v598_v29  ;;  %v308_v1 = vmul.f32 %v560_v10, %v606_v34  ;;  %v314_v29 = vmul.f32 %v590_v25, %v626_v49 }
  0x1d   :  { %52 = vst.msk [vmem:[#allocation2] sm:$0xff] %vm51_vm0, %v503_v50  ;;  %v274_v53 = vadd.f32 %v252_v6, %v251_v5 }
  0x1e   :  { %146 = vadd.xlane.f32.xlu1 %v145_v26  ;;  %v256_v26 = vadd.f32 %v240_v8, %v239_v7  ;;  %53 = vst.msk [vmem:[#allocation2 + $0x8] sm:$0xff] %vm51_vm0, %v503_v50 }
  0x1f   :  { %143 = vadd.xlane.f32.xlu0 %v142_v27  ;;  %v243_v27 = vmul.f32 %v558_v9, %v558_v9  ;;  %55 = vst.msk [vmem:[#allocation2 + $0x18] sm:$0xff] %vm51_vm0, %v503_v50 }
  0x20   :  { %190 = vadd.xlane.f32.xlu2 %v189_v31  ;;  %v244_v31 = vmul.f32 %v560_v10, %v560_v10  ;;  %56 = vst.msk [vmem:[#allocation2 + $0x20] sm:$0xff] %vm51_vm0, %v503_v50 }
  0x21   :  { %57 = vst.msk [vmem:[#allocation2 + $0x28] sm:$0xff] %vm51_vm0, %v503_v50 }
  0x22   :  { %v262_v39 = vadd.f32 %v244_v31, %v243_v27  ;;  %58 = vst.msk [vmem:[#allocation2 + $0x30] sm:$0xff] %vm51_vm0, %v503_v50 }
  0x23   :  { %59 = vst.msk [vmem:[#allocation2 + $0x38] sm:$0xff] %vm51_vm0, %v503_v50 }
  0x24   :  { %60 = vst.msk [vmem:[#allocation3] sm:$0xff] %vm51_vm0, %v503_v50  ;;  %v116_v25 = vld [vmem:[#allocation2] sm:$0xff] }
  0x25   :  { %61 = vst.msk [vmem:[#allocation3 + $0x8] sm:$0xff] %vm51_vm0, %v503_v50 }
  0x26   :  { %196 = vadd.xlane.f32.xlu1 %v195_v41  ;;  %v265_v41 = vadd.f32 %v246_v38, %v245_v37  ;;  %62 = vst.msk [vmem:[#allocation3 + $0x10] sm:$0xff] %vm51_vm0, %v503_v50  ;;  %v119_v49 = vld [vmem:[#allocation2 + $0x18] sm:$0xff] }
  0x27   :  { %193 = vadd.xlane.f32.xlu0 %v192_v42  ;;  %v249_v42 = vmul.f32 %v588_v24, %v588_v24  ;;  %63 = vst.msk [vmem:[#allocation3 + $0x18] sm:$0xff] %vm51_vm0, %v503_v50  ;;  %v120_v30 = vld [vmem:[#allocation2 + $0x20] sm:$0xff] }
  0x28   :  { %199 = vadd.xlane.f32.xlu2 %v198_v46  ;;  %v247_v46 = vmul.f32 %v566_v13, %v566_v13  ;;  %64 = vst.msk [vmem:[#allocation3 + $0x20] sm:$0xff] %vm51_vm0, %v503_v50  ;;  %v121_v63 = vld [vmem:[#allocation2 + $0x28] sm:$0xff] }
  0x29   :  { %v271_v51 = vadd.f32 %v250_v45, %v249_v42  ;;  %65 = vst.msk [vmem:[#allocation3 + $0x28] sm:$0xff] %vm51_vm0, %v503_v50 }
  0x2a   :  { %v268_v52 = vadd.f32 %v248_v47, %v247_v46  ;;  %66 = vst.msk [vmem:[#allocation3 + $0x30] sm:$0xff] %vm51_vm0, %v503_v50 }
  0x2b   :  { %67 = vst.msk [vmem:[#allocation3 + $0x38] sm:$0xff] %vm51_vm0, %v503_v50 }
  0x2c   :  { %68 = vst.msk [vmem:[#allocation4] sm:$0xff] %vm51_vm0, %v503_v50  ;;  %v166_v45 = vld [vmem:[#allocation3 + $0x8] sm:$0xff] }
  0x2d   :  { %69 = vst.msk [vmem:[#allocation4 + $0x8] sm:$0xff] %vm51_vm0, %v503_v50 }
  0x2e   :  { %205 = vadd.xlane.f32.xlu1 %v204_v56  ;;  %v301_v56 = vmul.f32 %v544_v2, %v576_v18  ;;  %v320_v2 = vadd.f32 %v304_v55, %v303_v54  ;;  %v311_v18 = vmul.f32 %v566_v13, %v620_v43  ;;  %70 = vst.msk [vmem:[#allocation4 + $0x10] sm:$0xff] %vm51_vm0, %v503_v50 }
  0x2f   :  { %202 = vadd.xlane.f32.xlu0 %v201_v57  ;;  %v302_v57 = vmul.f32 %v548_v4, %v578_v19  ;;  %v312_v19 = vmul.f32 %v568_v14, %v622_v44  ;;  %71 = vst.msk [vmem:[#allocation4 + $0x18] sm:$0xff] %vm51_vm0, %v503_v50  ;;  %v315_v13 = vmul.f32 %v580_v20, %v636_v58 }
  0x30   :  { %208 = vadd.xlane.f32.xlu2 %v207_v60  ;;  %v305_v60 = vmul.f32 %v540_v0, %v596_v28  ;;  %v307_v0 = vmul.f32 %v558_v9, %v604_v33  ;;  %72 = vst.msk [vmem:[#allocation4 + $0x20] sm:$0xff] %vm51_vm0, %v503_v50  ;;  %v316_v14 = vmul.f32 %v582_v21, %v638_v59  ;;  %v117_v59 = vld [vmem:[#allocation2 + $0x8] sm:$0xff] }
  0x31   :  { %v317_v4 = vadd.f32 %v302_v57, %v301_v56  ;;  %v332_v10 = vadd.f32 %v312_v19, %v311_v18  ;;  %73 = vst.msk [vmem:[#allocation4 + $0x28] sm:$0xff] %vm51_vm0, %v503_v50  ;;  %v313_v28 = vmul.f32 %v588_v24, %v624_v48  ;;  %v118_v24 = vld [vmem:[#allocation2 + $0x10] sm:$0xff]  ;;  %v170_v56 = vld [vmem:[#allocation3 + $0x28] sm:$0xff]  ;;  %v169_v57 = vld [vmem:[#allocation3 + $0x20] sm:$0xff] }
  0x32   :  { %v323_v12 = vadd.f32 %v306_v11, %v305_v60  ;;  %v326_v9 = vadd.f32 %v308_v1, %v307_v0  ;;  %74 = vst.msk [vmem:[#allocation4 + $0x30] sm:$0xff] %vm51_vm0, %v503_v50  ;;  %v338_v20 = vadd.f32 %v316_v14, %v315_v13  ;;  %v171_v11 = vld [vmem:[#allocation3 + $0x30] sm:$0xff]  ;;  %v172_v13 = vld [vmem:[#allocation3 + $0x38] sm:$0xff] }
  0x33   :  { %75 = vst.msk [vmem:[#allocation4 + $0x38] sm:$0xff] %vm51_vm0, %v503_v50  ;;  %v335_v21 = vadd.f32 %v314_v29, %v313_v28 }
  0x34   :  { %76 = vst.msk [vmem:[#allocation5] sm:$0xff] %vm51_vm0, %v503_v50 }
  0x35   :  { %77 = vst.msk [vmem:[#allocation5 + $0x8] sm:$0xff] %vm51_vm0, %v503_v50 }
  0x36   :  { %254 = vadd.xlane.f32.xlu1 %v253_v22  ;;  %78 = vst.msk [vmem:[#allocation5 + $0x10] sm:$0xff] %vm51_vm0, %v503_v50  ;;  %v123_v22 = vld [vmem:[#allocation2 + $0x38] sm:$0xff] }
  0x37   :  { %211 = vadd.xlane.f32.xlu0 %v210_v23  ;;  %79 = vst.msk [vmem:[#allocation5 + $0x18] sm:$0xff] %vm51_vm0, %v503_v50  ;;  %v122_v23 = vld [vmem:[#allocation2 + $0x30] sm:$0xff] }
  0x38   :  { %257 = vadd.xlane.f32.xlu2 %v256_v26  ;;  %80 = vst.msk [vmem:[#allocation5 + $0x20] sm:$0xff] %vm51_vm0, %v503_v50  ;;  %v165_v26 = vld [vmem:[#allocation3] sm:$0xff] }
  0x39   :  { %81 = vst.msk [vmem:[#allocation5 + $0x28] sm:$0xff] %vm51_vm0, %v503_v50 }
  0x3a   :  { %82 = vst.msk [vmem:[#allocation5 + $0x30] sm:$0xff] %vm51_vm0, %v503_v50 }
  0x3b   :  { %83 = vst.msk [vmem:[#allocation5 + $0x38] sm:$0xff] %vm51_vm0, %v503_v50  ;;  %v168_v50 = vld [vmem:[#allocation3 + $0x18] sm:$0xff] }
  0x3e   :  { %263 = vadd.xlane.f32.xlu1 %v262_v39 }
  0x3f   :  { %260 = vadd.xlane.f32.xlu0 %v259_v40 }
  0x40   :  { %266 = vadd.xlane.f32.xlu2 %v265_v41  ;;  %v167_v41 = vld [vmem:[#allocation3 + $0x10] sm:$0xff] }
  0x46   :  { %272 = vadd.xlane.f32.xlu1 %v271_v51 }
  0x47   :  { %269 = vadd.xlane.f32.xlu0 %v268_v52 }
  0x48   :  { %275 = vadd.xlane.f32.xlu2 %v274_v53 }
  0x4e   :  { %321 = vadd.xlane.f32.xlu1 %v320_v2 }
  0x4f   :  { %318 = vadd.xlane.f32.xlu0 %v317_v4 }
  0x50   :  { %324 = vadd.xlane.f32.xlu2 %v323_v12 }
  0x56   :  { %330 = vadd.xlane.f32.xlu1 %v654_v17 }
  0x57   :  { %327 = vadd.xlane.f32.xlu0 %v326_v9  ;;  %v229_v9 = vld [vmem:[#allocation4] sm:$0xff] }
  0x58   :  { %333 = vadd.xlane.f32.xlu2 %v332_v10 }
  0x5e   :  { %339 = vadd.xlane.f32.xlu1 %v338_v20 }
  0x5f   :  { %336 = vadd.xlane.f32.xlu0 %v335_v21  ;;  %v230_v21 = vld [vmem:[#allocation4 + $0x8] sm:$0xff] }
  0x81   :  { %v132_v32 = vpop.xlane.xlu1 %131 }
  0x82   :  { %v150_v33 = vadd.f32 %v132_v32, %v118_v24  ;;  %v126_v34 = vpop.xlane.xlu0 %125 }
  0x83   :  { %v138_v43 = vpop.xlane.xlu2 %137  ;;  %v148_v44 = vadd.f32 %v126_v34, %v116_v25  ;;  %v232_v34 = vld [vmem:[#allocation4 + $0x18] sm:$0xff] }
  0x84   :  { %v152_v48 = vadd.f32 %v138_v43, %v120_v30  ;;  %159 = vst.msk [vmem:[#allocation2 + $0x10] sm:$0xff] %vm51_vm0, %v150_v33  ;;  %v231_v43 = vld [vmem:[#allocation4 + $0x10] sm:$0xff] }
  0x85   :  { %157 = vst.msk [vmem:[#allocation2] sm:$0xff] %vm51_vm0, %v148_v44 }
  0x86   :  { %161 = vst.msk [vmem:[#allocation2 + $0x20] sm:$0xff] %vm51_vm0, %v152_v48  ;;  %v233_v48 = vld [vmem:[#allocation4 + $0x20] sm:$0xff] }
  0x89   :  { %v135_v58 = vpop.xlane.xlu1 %134 }
  0x8a   :  { %v129_v61 = vpop.xlane.xlu0 %128  ;;  %v151_v7 = vadd.f32 %v135_v58, %v119_v49 }
  0x8b   :  { %v141_v62 = vpop.xlane.xlu2 %140  ;;  %v362_v3 = vld [vmem:[#allocation2 + $0x10] sm:$0xff]  ;;  %v149_v15 = vadd.f32 %v129_v61, %v117_v59 }
  0x8c   :  { %370 = vst.msk [vmem:[%s935_s2 + $0x10] sm:$0xff] %vm51_vm0, %v362_v3  ;;  %v360_v8 = vld [vmem:[#allocation2] sm:$0xff]  ;;  %v153_v17 = vadd.f32 %v141_v62, %v121_v63 }
  0x8d   :  { %368 = vst.msk [vmem:[%s935_s2] sm:$0xff] %vm51_vm0, %v360_v8  ;;  %v364_v16 = vld [vmem:[#allocation2 + $0x20] sm:$0xff] }
  0x8e   :  { %372 = vst.msk [vmem:[%s935_s2 + $0x20] sm:$0xff] %vm51_vm0, %v364_v16 }
  0x8f   :  { %160 = vst.msk [vmem:[#allocation2 + $0x18] sm:$0xff] %vm51_vm0, %v151_v7  ;;  %v235_v7 = vld [vmem:[#allocation4 + $0x30] sm:$0xff] }
  0x90   :  { %158 = vst.msk [vmem:[#allocation2 + $0x8] sm:$0xff] %vm51_vm0, %v149_v15  ;;  %v234_v15 = vld [vmem:[#allocation4 + $0x28] sm:$0xff] }
  0x91   :  { %162 = vst.msk [vmem:[#allocation2 + $0x28] sm:$0xff] %vm51_vm0, %v153_v17  ;;  %v147_v27 = vpop.xlane.xlu1 %146 }
  0x92   :  { %v155_v31 = vadd.f32 %v147_v27, %v123_v22  ;;  %v144_v35 = vpop.xlane.xlu0 %143 }
  0x93   :  { %v191_v36 = vpop.xlane.xlu2 %190  ;;  %v154_v37 = vadd.f32 %v144_v35, %v122_v23 }
  0x94   :  { %v213_v38 = vadd.f32 %v191_v36, %v165_v26  ;;  %164 = vst.msk [vmem:[#allocation2 + $0x38] sm:$0xff] %vm51_vm0, %v155_v31  ;;  %v236_v26 = vld [vmem:[#allocation4 + $0x38] sm:$0xff] }
  0x95   :  { %163 = vst.msk [vmem:[#allocation2 + $0x30] sm:$0xff] %vm51_vm0, %v154_v37 }
  0x96   :  { %v363_v39 = vld [vmem:[#allocation2 + $0x18] sm:$0xff]  ;;  %221 = vst.msk [vmem:[#allocation3] sm:$0xff] %vm51_vm0, %v213_v38  ;;  %v294_v38 = vld [vmem:[#allocation5 + $0x8] sm:$0xff] }
  0x97   :  { %371 = vst.msk [vmem:[%s935_s2 + $0x18] sm:$0xff] %vm51_vm0, %v363_v39  ;;  %v361_v40 = vld [vmem:[#allocation2 + $0x8] sm:$0xff]  ;;  %v293_v39 = vld [vmem:[#allocation5] sm:$0xff] }
  0x98   :  { %369 = vst.msk [vmem:[%s935_s2 + $0x8] sm:$0xff] %vm51_vm0, %v361_v40  ;;  %v365_v42 = vld [vmem:[#allocation2 + $0x28] sm:$0xff] }
  0x99   :  { %373 = vst.msk [vmem:[%s935_s2 + $0x28] sm:$0xff] %vm51_vm0, %v365_v42  ;;  %v197_v46 = vpop.xlane.xlu1 %196 }
  0x9a   :  { %v215_v47 = vadd.f32 %v197_v46, %v167_v41  ;;  %v194_v5 = vpop.xlane.xlu0 %193  ;;  %v295_v41 = vld [vmem:[#allocation5 + $0x10] sm:$0xff] }
  0x9b   :  { %v200_v6 = vpop.xlane.xlu2 %199  ;;  %v367_v51 = vld [vmem:[#allocation2 + $0x38] sm:$0xff]  ;;  %v214_v52 = vadd.f32 %v194_v5, %v166_v45 }
  0x9c   :  { %375 = vst.msk [vmem:[%s935_s2 + $0x38] sm:$0xff] %vm51_vm0, %v367_v51  ;;  %v366_v53 = vld [vmem:[#allocation2 + $0x30] sm:$0xff]  ;;  %v216_v55 = vadd.f32 %v200_v6, %v168_v50  ;;  %v297_v51 = vld [vmem:[#allocation5 + $0x20] sm:$0xff] }
  0x9d   :  { %374 = vst.msk [vmem:[%s935_s2 + $0x30] sm:$0xff] %vm51_vm0, %v366_v53  ;;  %v376_v54 = vld [vmem:[#allocation3] sm:$0xff]  ;;  %v296_v53 = vld [vmem:[#allocation5 + $0x18] sm:$0xff] }
  0x9e   :  { %223 = vst.msk [vmem:[#allocation3 + $0x10] sm:$0xff] %vm51_vm0, %v215_v47 }
  0x9f   :  { %222 = vst.msk [vmem:[#allocation3 + $0x8] sm:$0xff] %vm51_vm0, %v214_v52 }
  0xa0   :  { %384 = vst.msk [vmem:[%s936_s3] sm:$0xff] %vm51_vm0, %v376_v54 }
  0xa1   :  { %v206_v60 = vpop.xlane.xlu1 %205  ;;  %224 = vst.msk [vmem:[#allocation3 + $0x18] sm:$0xff] %vm51_vm0, %v216_v55 }
  0xa2   :  { %v218_v2 = vadd.f32 %v206_v60, %v170_v56  ;;  %v203_v4 = vpop.xlane.xlu0 %202  ;;  %v298_v60 = vld [vmem:[#allocation5 + $0x28] sm:$0xff] }
  0xa3   :  { %v209_v12 = vpop.xlane.xlu2 %208  ;;  %v217_v0 = vadd.f32 %v203_v4, %v169_v57 }
  0xa4   :  { %226 = vst.msk [vmem:[#allocation3 + $0x28] sm:$0xff] %vm51_vm0, %v218_v2  ;;  %v219_v1 = vadd.f32 %v209_v12, %v171_v11 }
  0xa5   :  { %v378_v18 = vld [vmem:[#allocation3 + $0x10] sm:$0xff]  ;;  %225 = vst.msk [vmem:[#allocation3 + $0x20] sm:$0xff] %vm51_vm0, %v217_v0 }
  0xa6   :  { %386 = vst.msk [vmem:[%s936_s3 + $0x10] sm:$0xff] %vm51_vm0, %v378_v18  ;;  %v377_v19 = vld [vmem:[#allocation3 + $0x8] sm:$0xff]  ;;  %v299_v18 = vld [vmem:[#allocation5 + $0x30] sm:$0xff] }
  0xa7   :  { %385 = vst.msk [vmem:[%s936_s3 + $0x8] sm:$0xff] %vm51_vm0, %v377_v19 }
  0xa8   :  { %v379_v10 = vld [vmem:[#allocation3 + $0x18] sm:$0xff]  ;;  %227 = vst.msk [vmem:[#allocation3 + $0x30] sm:$0xff] %vm51_vm0, %v219_v1 }
  0xa9   :  { %387 = vst.msk [vmem:[%s936_s3 + $0x18] sm:$0xff] %vm51_vm0, %v379_v10  ;;  %v255_v14 = vpop.xlane.xlu1 %254  ;;  %v300_v1 = vld [vmem:[#allocation5 + $0x38] sm:$0xff] }
  0xaa   :  { %v277_v28 = vadd.f32 %v255_v14, %v229_v9  ;;  %v212_v29 = vpop.xlane.xlu0 %211 }
  0xab   :  { %v258_v20 = vpop.xlane.xlu2 %257  ;;  %v381_v24 = vld [vmem:[#allocation3 + $0x28] sm:$0xff]  ;;  %v220_v25 = vadd.f32 %v212_v29, %v172_v13 }
  0xac   :  { %389 = vst.msk [vmem:[%s936_s3 + $0x28] sm:$0xff] %vm51_vm0, %v381_v24  ;;  %v380_v30 = vld [vmem:[#allocation3 + $0x20] sm:$0xff]  ;;  %v278_v32 = vadd.f32 %v258_v20, %v230_v21 }
  0xad   :  { %388 = vst.msk [vmem:[%s936_s3 + $0x20] sm:$0xff] %vm51_vm0, %v380_v30 }
  0xae   :  { %285 = vst.msk [vmem:[#allocation4] sm:$0xff] %vm51_vm0, %v277_v28 }
  0xaf   :  { %228 = vst.msk [vmem:[#allocation3 + $0x38] sm:$0xff] %vm51_vm0, %v220_v25  ;;  %v382_v33 = vld [vmem:[#allocation3 + $0x30] sm:$0xff] }
  0xb0   :  { %390 = vst.msk [vmem:[%s936_s3 + $0x30] sm:$0xff] %vm51_vm0, %v382_v33 }
  0xb1   :  { %v264_v44 = vpop.xlane.xlu1 %263  ;;  %286 = vst.msk [vmem:[#allocation4 + $0x8] sm:$0xff] %vm51_vm0, %v278_v32 }
  0xb2   :  { %v280_v49 = vadd.f32 %v264_v44, %v232_v34  ;;  %v261_v58 = vpop.xlane.xlu0 %260 }
  0xb3   :  { %v267_v59 = vpop.xlane.xlu2 %266  ;;  %v279_v61 = vadd.f32 %v261_v58, %v231_v43 }
  0xb4   :  { %288 = vst.msk [vmem:[#allocation4 + $0x18] sm:$0xff] %vm51_vm0, %v280_v49  ;;  %v281_v62 = vadd.f32 %v267_v59, %v233_v48 }
  0xb5   :  { %v392_v63 = vld [vmem:[#allocation4] sm:$0xff]  ;;  %287 = vst.msk [vmem:[#allocation4 + $0x10] sm:$0xff] %vm51_vm0, %v279_v61 }
  0xb6   :  { %400 = vst.msk [vmem:[%s937_s4] sm:$0xff] %vm51_vm0, %v392_v63  ;;  %v383_v3 = vld [vmem:[#allocation3 + $0x38] sm:$0xff] }
  0xb7   :  { %391 = vst.msk [vmem:[%s936_s3 + $0x38] sm:$0xff] %vm51_vm0, %v383_v3 }
  0xb8   :  { %v393_v8 = vld [vmem:[#allocation4 + $0x8] sm:$0xff]  ;;  %289 = vst.msk [vmem:[#allocation4 + $0x20] sm:$0xff] %vm51_vm0, %v281_v62 }
  0xb9   :  { %401 = vst.msk [vmem:[%s937_s4 + $0x8] sm:$0xff] %vm51_vm0, %v393_v8  ;;  %v273_v16 = vpop.xlane.xlu1 %272 }
  0xba   :  { %v283_v17 = vadd.f32 %v273_v16, %v235_v7  ;;  %v270_v22 = vpop.xlane.xlu0 %269 }
  0xbb   :  { %v276_v23 = vpop.xlane.xlu2 %275  ;;  %v395_v27 = vld [vmem:[#allocation4 + $0x18] sm:$0xff]  ;;  %v282_v31 = vadd.f32 %v270_v22, %v234_v15 }
  0xbc   :  { %403 = vst.msk [vmem:[%s937_s4 + $0x18] sm:$0xff] %vm51_vm0, %v395_v27  ;;  %v394_v35 = vld [vmem:[#allocation4 + $0x10] sm:$0xff]  ;;  %v284_v36 = vadd.f32 %v276_v23, %v236_v26 }
  0xbd   :  { %402 = vst.msk [vmem:[%s937_s4 + $0x10] sm:$0xff] %vm51_vm0, %v394_v35 }
  0xbe   :  { %291 = vst.msk [vmem:[#allocation4 + $0x30] sm:$0xff] %vm51_vm0, %v283_v17 }
  0xbf   :  { %290 = vst.msk [vmem:[#allocation4 + $0x28] sm:$0xff] %vm51_vm0, %v282_v31  ;;  %v396_v37 = vld [vmem:[#allocation4 + $0x20] sm:$0xff] }
  0xc0   :  { %404 = vst.msk [vmem:[%s937_s4 + $0x20] sm:$0xff] %vm51_vm0, %v396_v37 }
  0xc1   :  { %v322_v40 = vpop.xlane.xlu1 %321  ;;  %292 = vst.msk [vmem:[#allocation4 + $0x38] sm:$0xff] %vm51_vm0, %v284_v36 }
  0xc2   :  { %v342_v42 = vadd.f32 %v322_v40, %v294_v38  ;;  %v319_v45 = vpop.xlane.xlu0 %318 }
  0xc3   :  { %v325_v46 = vpop.xlane.xlu2 %324  ;;  %v341_v47 = vadd.f32 %v319_v45, %v293_v39 }
  0xc4   :  { %350 = vst.msk [vmem:[#allocation5 + $0x8] sm:$0xff] %vm51_vm0, %v342_v42  ;;  %v343_v5 = vadd.f32 %v325_v46, %v295_v41 }
  0xc5   :  { %v398_v6 = vld [vmem:[#allocation4 + $0x30] sm:$0xff]  ;;  %349 = vst.msk [vmem:[#allocation5] sm:$0xff] %vm51_vm0, %v341_v47 }
  0xc6   :  { %406 = vst.msk [vmem:[%s937_s4 + $0x30] sm:$0xff] %vm51_vm0, %v398_v6  ;;  %v397_v50 = vld [vmem:[#allocation4 + $0x28] sm:$0xff] }
  0xc7   :  { %405 = vst.msk [vmem:[%s937_s4 + $0x28] sm:$0xff] %vm51_vm0, %v397_v50 }
  0xc8   :  { %v399_v52 = vld [vmem:[#allocation4 + $0x38] sm:$0xff]  ;;  %351 = vst.msk [vmem:[#allocation5 + $0x10] sm:$0xff] %vm51_vm0, %v343_v5 }
  0xc9   :  { %407 = vst.msk [vmem:[%s937_s4 + $0x38] sm:$0xff] %vm51_vm0, %v399_v52  ;;  %v331_v54 = vpop.xlane.xlu1 %330 }
  0xca   :  { %v345_v55 = vadd.f32 %v331_v54, %v297_v51  ;;  %v328_v56 = vpop.xlane.xlu0 %327 }
  0xcb   :  { %v334_v57 = vpop.xlane.xlu2 %333  ;;  %v409_v11 = vld [vmem:[#allocation5 + $0x8] sm:$0xff]  ;;  %v344_v2 = vadd.f32 %v328_v56, %v296_v53 }
  0xcc   :  { %417 = vst.msk [vmem:[%s938_s5 + $0x8] sm:$0xff] %vm51_vm0, %v409_v11  ;;  %v408_v4 = vld [vmem:[#allocation5] sm:$0xff]  ;;  %v346_v12 = vadd.f32 %v334_v57, %v298_v60 }
  0xcd   :  { %416 = vst.msk [vmem:[%s938_s5] sm:$0xff] %vm51_vm0, %v408_v4 }
  0xce   :  { %353 = vst.msk [vmem:[#allocation5 + $0x20] sm:$0xff] %vm51_vm0, %v345_v55 }
  0xcf   :  { %352 = vst.msk [vmem:[#allocation5 + $0x18] sm:$0xff] %vm51_vm0, %v344_v2  ;;  %v410_v0 = vld [vmem:[#allocation5 + $0x10] sm:$0xff] }
  0xd0   :  { %418 = vst.msk [vmem:[%s938_s5 + $0x10] sm:$0xff] %vm51_vm0, %v410_v0 }
  0xd1   :  { %v340_v19 = vpop.xlane.xlu1 %339  ;;  %354 = vst.msk [vmem:[#allocation5 + $0x28] sm:$0xff] %vm51_vm0, %v346_v12 }
  0xd2   :  { %v348_v9 = vadd.f32 %v340_v19, %v300_v1  ;;  %v337_v10 = vpop.xlane.xlu0 %336 }
  0xd3   :  { %v347_v13 = vadd.f32 %v337_v10, %v299_v18 }
  0xd4   :  { %356 = vst.msk [vmem:[#allocation5 + $0x38] sm:$0xff] %vm51_vm0, %v348_v9 }
  0xd5   :  { %v412_v14 = vld [vmem:[#allocation5 + $0x20] sm:$0xff]  ;;  %355 = vst.msk [vmem:[#allocation5 + $0x30] sm:$0xff] %vm51_vm0, %v347_v13 }
  0xd6   :  { %420 = vst.msk [vmem:[%s938_s5 + $0x20] sm:$0xff] %vm51_vm0, %v412_v14  ;;  %v411_v28 = vld [vmem:[#allocation5 + $0x18] sm:$0xff] }
  0xd7   :  { %419 = vst.msk [vmem:[%s938_s5 + $0x18] sm:$0xff] %vm51_vm0, %v411_v28 }
  0xd8   :  { %v413_v29 = vld [vmem:[#allocation5 + $0x28] sm:$0xff] }
  0xd9   :  { %421 = vst.msk [vmem:[%s938_s5 + $0x28] sm:$0xff] %vm51_vm0, %v413_v29 }
  0xdb   :  { %v415_v20 = vld [vmem:[#allocation5 + $0x38] sm:$0xff] }
  0xdc   :  { %423 = vst.msk [vmem:[%s938_s5 + $0x38] sm:$0xff] %vm51_vm0, %v415_v20  ;;  %v414_v21 = vld [vmem:[#allocation5 + $0x30] sm:$0xff] }
  0xdd   :  { %422 = vst.msk [vmem:[%s938_s5 + $0x30] sm:$0xff] %vm51_vm0, %v414_v21 }
  0xde   :  { %440 = vsyncpa [#allocation7], 1 }
  0xdf   :  { %441 = vsyncpa [#allocation9], 1 }

</bundles_post_ra>
